<compile_context>
chip_gen: v5e
topology: v5e:2x2
jax: 0.10.0
libtpu: 0.0.40
codegen_flags: <defaults>
</compile_context>

<pallas_src>
import functools

import jax
import jax.numpy as jnp
from jax.experimental import pallas as pl
from jax.experimental.pallas import tpu as pltpu

EPS = 1e-5
_LANE = 128
_MAX_TILE_ROWS = 1024


def _layernorm_kernel(x_ref, gamma_ref, beta_ref, o_ref, *, d_actual):
    # x_ref: (TM, Dp) tile of rows; gamma/beta: (1, Dp).  Padded columns are
    # zero in x/gamma/beta, so sums over Dp equal sums over the real D and the
    # padded output columns come out exactly zero.
    x = x_ref[...].astype(jnp.float32)
    inv_d = jnp.float32(1.0 / d_actual)
    s = jnp.sum(x, axis=-1, keepdims=True)
    sq = jnp.sum(x * x, axis=-1, keepdims=True)
    mean = s * inv_d
    var = sq * inv_d - mean * mean
    var = jnp.maximum(var, 0.0)  # guard tiny negative from cancellation
    inv = jax.lax.rsqrt(var + EPS)
    y = (x - mean) * inv
    y = y * gamma_ref[...].astype(jnp.float32) + beta_ref[...].astype(jnp.float32)
    o_ref[...] = y.astype(o_ref.dtype)


def _vmem_capacity_bytes():
    """Physical VMEM per TensorCore (generation-aware, with a safe fallback)."""
    try:
        info = pltpu.get_tpu_info()
        cap = getattr(info, "vmem_capacity_bytes", None)
        if cap:
            return int(cap)
    except Exception:
        pass
    return 64 * 1024 * 1024  # conservative: v7x per-TC VMEM


def _sublane_multiple(dtype):
    # f32 -> 8, bf16 -> 16, int8/fp8 -> 32 (packed-dtype sublane granularity)
    itemsize = jnp.dtype(dtype).itemsize
    return max(8, 32 // itemsize)


def _pick_tile_rows(m, d_pad, in_dtype, out_dtype, vmem_cap):
    sub = _sublane_multiple(in_dtype)
    in_b = jnp.dtype(in_dtype).itemsize
    out_b = jnp.dtype(out_dtype).itemsize
    # Budget ~60% of physical VMEM for: double-buffered input + output tiles
    # plus ~2 tile-sized f32 compute temporaries.
    budget = int(vmem_cap * 0.6)
    per_row = d_pad * (2 * in_b + 2 * out_b + 2 * 4)
    t = max(sub, budget // max(per_row, 1))
    t = min(t, _MAX_TILE_ROWS)
    t = (t // sub) * sub
    t = max(t, sub)
    m_rounded = ((m + sub - 1) // sub) * sub
    return min(t, m_rounded)


def layernorm_pallas(x, gamma, beta):
    """LayerNorm over the last axis of x (any leading dims), torch-compatible."""
    orig_shape = x.shape
    D = orig_shape[-1]
    x2 = x.reshape(-1, D)
    M = x2.shape[0]

    # Lane-dense feature dim: pad D up to a multiple of 128.
    D_pad = max(_LANE, ((D + _LANE - 1) // _LANE) * _LANE)

    vmem_cap = _vmem_capacity_bytes()
    tile_rows = _pick_tile_rows(M, D_pad, x.dtype, x.dtype, vmem_cap)

    # Pad rows to a multiple of tile_rows (no divisibility assert).
    grid_m = pl.cdiv(M, tile_rows)
    M_pad = grid_m * tile_rows

    if M_pad != M or D_pad != D:
        x2 = jnp.pad(x2, ((0, M_pad - M), (0, D_pad - D)))

    gamma2 = gamma.reshape(1, D)
    beta2 = beta.reshape(1, D)
    if D_pad != D:
        gamma2 = jnp.pad(gamma2, ((0, 0), (0, D_pad - D)))
        beta2 = jnp.pad(beta2, ((0, 0), (0, D_pad - D)))

    in_b = jnp.dtype(x.dtype).itemsize
    out_b = in_b
    # Footprint: double-buffered in/out tiles + f32 temporaries + gamma/beta.
    footprint = tile_rows * D_pad * (2 * in_b + 2 * out_b + 2 * 4) + 4 * D_pad * 4
    vmem_limit = int(min(vmem_cap * 0.9, max(2 * footprint, 32 * 1024 * 1024)))

    kernel = functools.partial(_layernorm_kernel, d_actual=float(D))

    out = pl.pallas_call(
        kernel,
        out_shape=jax.ShapeDtypeStruct((M_pad, D_pad), x.dtype),
        grid_spec=pltpu.PrefetchScalarGridSpec(
            num_scalar_prefetch=0,
            grid=(grid_m,),
            in_specs=[
                pl.BlockSpec((tile_rows, D_pad), lambda i: (i, 0)),
                pl.BlockSpec((1, D_pad), lambda i: (0, 0)),
                pl.BlockSpec((1, D_pad), lambda i: (0, 0)),
            ],
            out_specs=pl.BlockSpec((tile_rows, D_pad), lambda i: (i, 0)),
        ),
        compiler_params=pltpu.CompilerParams(
            dimension_semantics=("parallel",),
            vmem_limit_bytes=vmem_limit,
        ),
    )(x2, gamma2, beta2)

    out = out[:M, :D]
    return out.reshape(orig_shape)


class PreNormPallas:
    """JAX/Pallas equivalent of:
        class PreNorm(nn.Module):
            def forward(self, x, map_attn, add_Map, **kwargs):
                return self.fn(self.norm(x), map_attn, add_Map, **kwargs)
    """

    def __init__(self, dim, fn):
        self.dim = dim
        self.fn = fn
        # nn.LayerNorm(dim) init: weight=1, bias=0 (deterministic)
        self.gamma = jnp.ones((dim,), dtype=jnp.float32)
        self.beta = jnp.zeros((dim,), dtype=jnp.float32)

    def __call__(self, x, map_attn, add_Map, **kwargs):
        normed = layernorm_pallas(x, self.gamma, self.beta)
        return self.fn(normed, map_attn, add_Map, **kwargs)


if __name__ == "__main__":
    key = jax.random.PRNGKey(0)
    B, N, D = 2, 8, 32  # batch, tokens, feature dim

    kx, km = jax.random.split(key)
    x = jax.random.normal(kx, (B, N, D), dtype=jnp.float32)
    map_attn = jax.random.normal(km, (B, N, N), dtype=jnp.float32)
    add_Map = True

    # Simple stand-in for the wrapped fn (identity on the normed tensor, also
    # returning the attention map like UCTNet's Attention does).
    def dummy_fn(x_normed, map_attn, add_Map):
        if add_Map:
            return x_normed, map_attn
        return x_normed

    module = PreNormPallas(D, dummy_fn)
    out, attn = module(x, map_attn, add_Map)
    jax.block_until_ready(out)
    jax.block_until_ready(attn)

    # Correctness check against plain-JAX LayerNorm reference (torch semantics:
    # biased variance, eps inside the sqrt).
    ref = (x - x.mean(-1, keepdims=True)) / jnp.sqrt(x.var(-1, keepdims=True) + EPS)
    ref = ref * module.gamma + module.beta
    assert jnp.allclose(out, ref, atol=1e-5, rtol=1e-5), "mismatch vs reference"

    print("KERNEL_OK")
</pallas_src>

<mosaic_0001>
module attributes {stable_mosaic.version = 11 : i64} {
  func.func @_layernorm_kernel(%arg0: i32, %arg1: memref<16x128xf32, #tpu.memory_space<vmem>>, %arg2: memref<1x128xf32, #tpu.memory_space<vmem>>, %arg3: memref<1x128xf32, #tpu.memory_space<vmem>>, %arg4: memref<16x128xf32, #tpu.memory_space<vmem>>) attributes {dimension_semantics = [#tpu.dimension_semantics<parallel>], iteration_bounds = array<i64: 1>, scalar_prefetch = 0 : i64, scratch_operands = 0 : i64, tpu.core_type = #tpu.core_type<tc>, window_params = [{transform_indices = @transform_0, window_bounds = array<i64: 16, 128>}, {pipeline_mode = #tpu.pipeline_mode<synchronous>, transform_indices = @transform_1, window_bounds = array<i64: 1, 128>}, {pipeline_mode = #tpu.pipeline_mode<synchronous>, transform_indices = @transform_2, window_bounds = array<i64: 1, 128>}, {transform_indices = @transform_3, window_bounds = array<i64: 16, 128>}]} {
    %c0 = arith.constant 0 : index
    %c0_0 = arith.constant 0 : index
    %0 = vector.load %arg1[%c0, %c0_0] : memref<16x128xf32, #tpu.memory_space<vmem>>, vector<16x128xf32>
    %cst = arith.constant dense<0.000000e+00> : vector<16xf32>
    %1 = vector.multi_reduction <add>, %0, %cst [1] : vector<16x128xf32> to vector<16xf32>
    %2 = vector.shape_cast %1 : vector<16xf32> to vector<16x1xf32>
    %3 = arith.mulf %0, %0 : vector<16x128xf32>
    %cst_1 = arith.constant dense<0.000000e+00> : vector<16xf32>
    %4 = vector.multi_reduction <add>, %3, %cst_1 [1] : vector<16x128xf32> to vector<16xf32>
    %5 = vector.shape_cast %4 : vector<16xf32> to vector<16x1xf32>
    %cst_2 = arith.constant 3.125000e-02 : f32
    %6 = vector.broadcast %cst_2 : f32 to vector<16x1xf32>
    %7 = arith.mulf %2, %6 : vector<16x1xf32>
    %cst_3 = arith.constant 3.125000e-02 : f32
    %8 = vector.broadcast %cst_3 : f32 to vector<16x1xf32>
    %9 = arith.mulf %5, %8 : vector<16x1xf32>
    %10 = arith.mulf %7, %7 : vector<16x1xf32>
    %11 = arith.subf %9, %10 : vector<16x1xf32>
    %cst_4 = arith.constant 0.000000e+00 : f32
    %12 = vector.broadcast %cst_4 : f32 to vector<16x1xf32>
    %13 = arith.maximumf %11, %12 : vector<16x1xf32>
    %cst_5 = arith.constant 9.99999974E-6 : f32
    %14 = vector.broadcast %cst_5 : f32 to vector<16x1xf32>
    %15 = arith.addf %13, %14 : vector<16x1xf32>
    %16 = math.rsqrt %15 : vector<16x1xf32>
    %17 = vector.broadcast %7 : vector<16x1xf32> to vector<16x128xf32>
    %18 = arith.subf %0, %17 : vector<16x128xf32>
    %19 = vector.broadcast %16 : vector<16x1xf32> to vector<16x128xf32>
    %20 = arith.mulf %18, %19 : vector<16x128xf32>
    %c0_6 = arith.constant 0 : index
    %c0_7 = arith.constant 0 : index
    %21 = vector.load %arg2[%c0_6, %c0_7] : memref<1x128xf32, #tpu.memory_space<vmem>>, vector<1x128xf32>
    %22 = vector.broadcast %21 : vector<1x128xf32> to vector<16x128xf32>
    %23 = arith.mulf %20, %22 : vector<16x128xf32>
    %c0_8 = arith.constant 0 : index
    %c0_9 = arith.constant 0 : index
    %24 = vector.load %arg3[%c0_8, %c0_9] : memref<1x128xf32, #tpu.memory_space<vmem>>, vector<1x128xf32>
    %25 = vector.broadcast %24 : vector<1x128xf32> to vector<16x128xf32>
    %26 = arith.addf %23, %25 : vector<16x128xf32>
    %c0_10 = arith.constant 0 : index
    %c0_11 = arith.constant 0 : index
    %27 = vector.load %arg4[%c0_10, %c0_11] : memref<16x128xf32, #tpu.memory_space<vmem>>, vector<16x128xf32>
    tpu.vector_store %arg4[%c0_10, %c0_11], %26 {strides = array<i32>} : memref<16x128xf32, #tpu.memory_space<vmem>>, vector<16x128xf32>,
    return
  }
  func.func @transform_0(%arg0: i32) -> (i32, i32) {
    %c0_i32 = arith.constant 0 : i32
    %c0_i32_0 = arith.constant 0 : i32
    return %arg0, %c0_i32 : i32, i32
  }
  func.func @transform_1(%arg0: i32) -> (i32, i32) {
    %c0_i32 = arith.constant 0 : i32
    %c0_i32_0 = arith.constant 0 : i32
    %c0_i32_1 = arith.constant 0 : i32
    return %c0_i32, %c0_i32_0 : i32, i32
  }
  func.func @transform_2(%arg0: i32) -> (i32, i32) {
    %c0_i32 = arith.constant 0 : i32
    %c0_i32_0 = arith.constant 0 : i32
    %c0_i32_1 = arith.constant 0 : i32
    return %c0_i32, %c0_i32_0 : i32, i32
  }
  func.func @transform_3(%arg0: i32) -> (i32, i32) {
    %c0_i32 = arith.constant 0 : i32
    %c0_i32_0 = arith.constant 0 : i32
    return %arg0, %c0_i32 : i32, i32
  }
}

</mosaic_0001>

<bundles_post_ra>
// kernel: tpu_custom_call.1
= control target key start
LH: loop header
LB: loop body
LE: loop exit
PB: predicated region body
PF: predicated region fallthrough
CT: control target
= control target key end

     0   :  { %8 = vsyncpa [#allocation3], 0  ;;  %s259_s0 = inlined_call_operand.hbm [shape: f32[16,128], index: 0, kind: input, shape index: {}]   ;;  %s260_s1 = inlined_call_operand.hbm [shape: f32[1,128], index: 1, kind: input, shape index: {}]   ;;  %s261_s2 = inlined_call_operand.vmem [shape: f32[1,128], index: 2, kind: input, shape index: {}]   ;;  %s262_s3 = inlined_call_operand.hbm [shape: f32[16,128], index: 3, kind: output, shape index: {}]  }
   0x1   :  { %9 = vsyncpa [#allocation6], 0 }
   0x2   :  { %10 = vsyncpa [#allocation4], 0  ;;  %s15_s14 = sshll.u32 %s259_s0, 4  ;;  %s216_s15 = smov [#allocation2]   ;;  %s16_s14 = int_to_ptr.hbm [resolvable:$true] %s15_s14 }
   0x3   :  { %s17_s16 = sshll.u32 %s216_s15, 4  ;;  %s29_s19 = sshll.u32 %s260_s1, 4  ;;  %s18_s16 = int_to_ptr.vmem [resolvable:$true] %s17_s16  ;;  %s30_s19 = int_to_ptr.hbm [resolvable:$true] %s29_s19 }
   0x4   :  { %s217_s20 = smov 128   ;;  %s218_s21 = smov 8  }
   0x5   :  { %23 = dma.hbm_to_vmem [thread:$0]  %s16_s14, 256, %s18_s16, [#allocation3], %s217_s20, %s217_s20, %s218_s21  }
   0x6   :  { %s219_s22 = smov [#allocation5]  }
   0x7   :  { %s31_s23 = sshll.u32 %s219_s22, 4  ;;  %s32_s23 = int_to_ptr.vmem [resolvable:$true] %s31_s23 }
   0x8   :  { %34 = dma.hbm_to_vmem [thread:$0]  %s30_s19, 16, %s32_s23, [#allocation6]  }
   0x9   :  { %210 = dma.done.wait [#allocation3], 256  }
   0xa   :  { %211 = vsyncadd [#allocation3], 4294967040 }
   0xb   :  { %212 = dma.done.wait [#allocation6], 16  }
   0xc   :  { %213 = vsyncadd [#allocation6], 4294967280  ;;  %v45_v0 = vld [vmem:[#allocation2] sm:$0xff]  ;;  %v46_v2 = vld [vmem:[#allocation2 + $0x8] sm:$0xff]  ;;  %s220_s24 = smov [#allocation7]   ;;  %s113_s28 = sshll.u32 %s262_s3, 4  ;;  %s114_s28 = int_to_ptr.hbm [resolvable:$true] %s113_s28 }
   0xd   :  { %47 = vadd.xlane.f32.xlu0 %v45_v0  ;;  %v51_v1 = vmul.f32 %v45_v0, %v45_v0  ;;  %v52_v3 = vmul.f32 %v46_v2, %v46_v2  ;;  %v132_v29 = vld [vmem:[#allocation5] ss:$0 sm:$0xff]  ;;  %v133_v33 = vld [vmem:[%s261_s2] ss:$0 sm:$0xff]  ;;  %s111_s25 = sshll.u32 %s220_s24, 4  ;;  %s112_s25 = int_to_ptr.vmem [resolvable:$true] %s111_s25 }
   0xf   :  { %53 = vadd.xlane.f32.xlu1 %v51_v1 }
  0x15   :  { %49 = vadd.xlane.f32.xlu0 %v46_v2 }
  0x17   :  { %55 = vadd.xlane.f32.xlu1 %v52_v3 }
  0x80   :  { %v48_v4 = vpop.xlane.xlu0 %47 }
  0x81   :  { %v57_v5 = vmul.f32 0.03125, %v48_v4 }
  0x82   :  { %v54_v6 = vpop.xlane.xlu1 %53 }
  0x83   :  { %v61_v7 = vmul.f32 %v57_v5, %v57_v5  ;;  %v59_v8 = vmul.f32 0.03125, %v54_v6  ;;  %v89_v27 = vsub.f32 %v45_v0, %v57_v5 }
  0x85   :  { %v63_v9 = vsub.f32 %v59_v8, %v61_v7 }
  0x87   :  { %v65_v10 = vmax.f32 %v63_v9, 0.0 }
  0x88   :  { %v50_v11 = vpop.xlane.xlu0 %49 }
  0x89   :  { %v67_v12 = vadd.f32 1e-05, %v65_v10  ;;  %v58_v13 = vmul.f32 0.03125, %v50_v11 }
  0x8a   :  { %v56_v14 = vpop.xlane.xlu1 %55 }
  0x8b   :  { %134 = vrsqrt.f32 %v67_v12  ;;  %v62_v15 = vmul.f32 %v58_v13, %v58_v13  ;;  %v60_v16 = vmul.f32 0.03125, %v56_v14  ;;  %vm75_vm1 = vweird.f32 %v67_v12 }
  0x8c   :  { %v90_v39 = vsub.f32 %v46_v2, %v58_v13 }
  0x8d   :  { %v64_v17 = vsub.f32 %v60_v16, %v62_v15 }
  0x8f   :  { %v66_v18 = vmax.f32 %v64_v17, 0.0 }
  0x91   :  { %v135_v19 = vpop.eup %134  ;;  %v68_v21 = vadd.f32 1e-05, %v66_v18 }
  0x92   :  { %v70_v20 = vmul.f32 %v135_v19, %v67_v12  ;;  %vm76_vm0 = vweird.f32 %v135_v19 }
  0x93   :  { %136 = vrsqrt.f32 %v68_v21  ;;  %vm77_vm2 = vmor %vm75_vm1, %vm76_vm0  ;;  %vm85_vm4 = vweird.f32 %v68_v21 }
  0x94   :  { %v71_v22 = vmul.f32 %v135_v19, %v70_v20 }
  0x96   :  { %v72_v23 = vmul.f32 0.5, %v71_v22 }
  0x98   :  { %v73_v24 = vsub.f32 1.5, %v72_v23 }
  0x99   :  { %v137_v25 = vpop.eup %136 }
  0x9a   :  { %v74_v26 = vmul.f32 %v135_v19, %v73_v24  ;;  %v80_v28 = vmul.f32 %v137_v25, %v68_v21  ;;  %vm86_vm3 = vweird.f32 %v137_v25 }
  0x9b   :  { %vm87_vm5 = vmor %vm85_vm4, %vm86_vm3 }
  0x9c   :  { %v78_v30 = vsel %vm77_vm2, %v135_v19, %v74_v26  ;;  %v81_v31 = vmul.f32 %v137_v25, %v80_v28 }
  0x9d   :  { %v91_v32 = vmul.f32 %v89_v27, %v78_v30 }
  0x9e   :  { %v82_v34 = vmul.f32 0.5, %v81_v31 }
  0x9f   :  { %v97_v35 = vmul.f32 %v132_v29, %v91_v32 }
  0xa0   :  { %v83_v36 = vsub.f32 1.5, %v82_v34 }
  0xa1   :  { %v103_v37 = vadd.f32 %v133_v33, %v97_v35 }
  0xa2   :  { %v84_v38 = vmul.f32 %v137_v25, %v83_v36 }
  0xa3   :  { %105 = vst [vmem:[#allocation7] sm:$0xff] %v103_v37 }
  0xa4   :  { %v88_v40 = vsel %vm87_vm5, %v137_v25, %v84_v38 }
  0xa5   :  { %v92_v41 = vmul.f32 %v90_v39, %v88_v40 }
  0xa7   :  { %v98_v42 = vmul.f32 %v132_v29, %v92_v41 }
  0xa9   :  { %v104_v43 = vadd.f32 %v133_v33, %v98_v42 }
  0xab   :  { %106 = vst [vmem:[#allocation7 + $0x8] sm:$0xff] %v104_v43 }
  0xac   :  { %119 = dma.vmem_to_hbm [thread:$0]  %s112_s25, 256, %s114_s28, [#allocation4], %s217_s20, %s217_s20, %s218_s21  }
  0xad   :  { %214 = dma.done.wait [#allocation4], 256  }
  0xae   :  { %215 = vsyncadd [#allocation4], 4294967040 }
  0xaf   :  { %124 = vsyncpa [#allocation3], 1 }
  0xb0   :  { %125 = vsyncpa [#allocation6], 1 }
  0xb1   :  { %126 = vsyncpa [#allocation4], 1 }

</bundles_post_ra>
